<compile_context>
chip_gen: v6e
topology: v6e:2x2x1
jax: 0.10.0
libtpu: 0.0.40
codegen_flags: <defaults>
</compile_context>

<pallas_src>
import jax
import jax.numpy as jnp
from jax.experimental import pallas as pl
from jax.experimental.pallas import tpu as pltpu

NEG_SLOPE = 0.2   # PyG GATConv default negative_slope
LANE = 128        # TPU lane width


# ---------------------------------------------------------------------------
# Fused kernel: GATConv1 -> ReLU -> dropout(mask) -> L2 norm -> GATConv2
# ---------------------------------------------------------------------------
def gat_fused_kernel(x_ref, adj_ref, mask_ref,
                     w1_ref, as1_ref, ad1_ref, b1_ref,
                     w2_ref, as2_ref, ad2_ref, b2_ref,
                     emb_ref, out_ref):
    edge = adj_ref[...] > 0.0                                   # [N, N] bool

    def gat_layer(x, w, a_src, a_dst, bias):
        # H = X @ W on the MXU (bf16 operands, f32 accumulation)
        h = jnp.dot(x.astype(jnp.bfloat16), w.astype(jnp.bfloat16),
                    preferred_element_type=jnp.float32)          # [N, D] f32

        # attention logits via VPU multiply + lane reduction (keeps MXU free)
        s_dst = jnp.sum(h * a_dst, axis=1, keepdims=True)        # [N, 1]
        s_src = jnp.sum(h * a_src, axis=1, keepdims=True)        # [N, 1]

        # e[i, j] = LeakyReLU(s_dst[i] + s_src[j]), masked to edges
        e = s_dst + jnp.transpose(s_src)                         # [N, N]
        e = jnp.where(e > 0, e, NEG_SLOPE * e)
        e = jnp.where(edge, e, -1e30)

        # softmax over source nodes j; masked entries underflow to exactly 0
        e_max = jnp.max(e, axis=1, keepdims=True)
        p = jnp.exp(e - e_max)                                   # [N, N]
        denom = jnp.sum(p, axis=1, keepdims=True)                # >= 1 (self-loop)

        # aggregate first, normalize the [N, D] result (cheaper than [N, N])
        acc = jnp.dot(p.astype(jnp.bfloat16), h.astype(jnp.bfloat16),
                      preferred_element_type=jnp.float32)        # [N, D]
        return acc * (1.0 / denom) + bias

    # ---- layer 1 ----
    h1 = gat_layer(x_ref[...], w1_ref[...], as1_ref[...], ad1_ref[...],
                   b1_ref[...])

    # ---- ReLU -> dropout -> L2 normalize (F.normalize(p=2, dim=1)) ----
    h1 = jnp.maximum(h1, 0.0)
    h1 = h1 * mask_ref[...]          # precomputed {0, 1/(1-p)} scaled keep-mask
    sumsq = jnp.sum(h1 * h1, axis=1, keepdims=True)
    emb = h1 * jax.lax.rsqrt(jnp.maximum(sumsq, 1e-24))          # 1/max(||x||,1e-12)
    emb_ref[...] = emb

    # ---- layer 2 ----
    out_ref[...] = gat_layer(emb, w2_ref[...], as2_ref[...], ad2_ref[...],
                             b2_ref[...])


# ---------------------------------------------------------------------------
# Wrapper: padding glue, adjacency construction, dropout mask, pallas_call
# ---------------------------------------------------------------------------
def _round_up(v, m):
    return ((v + m - 1) // m) * m


def _pad2d(a, rows=None, cols=None):
    r = a.shape[0] if rows is None else rows
    c = a.shape[1] if cols is None else cols
    return jnp.pad(a, ((0, r - a.shape[0]), (0, c - a.shape[1])))


def gat_forward(params, x, edge_index, dropout_p, key):
    """Returns (embedding, logits) exactly like GAT.forward(data)."""
    n, feat = x.shape
    hid = params["w1"].shape[1]
    out = params["w2"].shape[1]
    feat_p = _round_up(feat, LANE)
    hid_p = _round_up(hid, LANE)
    out_p = _round_up(out, LANE)

    # dense adjacency adj[dst, src] = 1 plus self-loops (plain JAX glue).
    adj = jnp.zeros((n, n), jnp.float32).at[edge_index[1], edge_index[0]].set(1.0)
    adj = jnp.maximum(adj, jnp.eye(n, dtype=jnp.float32))

    # TODO(synk): dropout mask is generated host-side with jax.random because
    # pltpu.prng_seed has no interpret/CPU lowering; semantics match
    # F.dropout(p) statistically but not torch's RNG stream bit-for-bit.
    if dropout_p > 0.0:
        keep = jax.random.bernoulli(key, 1.0 - dropout_p, (n, hid_p))
        mask = keep.astype(jnp.float32) * (1.0 / (1.0 - dropout_p))
    else:
        mask = jnp.ones((n, hid_p), jnp.float32)

    # lane-dense zero padding of all feature dims (sliced back below; zeros do
    # not change matmuls, attention scores, dropout or the L2 norm).
    x_p = _pad2d(x, cols=feat_p)
    w1 = _pad2d(params["w1"], rows=feat_p, cols=hid_p)
    as1 = _pad2d(params["att_src1"], cols=hid_p)
    ad1 = _pad2d(params["att_dst1"], cols=hid_p)
    b1 = _pad2d(params["b1"], cols=hid_p)
    w2 = _pad2d(params["w2"], rows=hid_p, cols=out_p)
    as2 = _pad2d(params["att_src2"], cols=out_p)
    ad2 = _pad2d(params["att_dst2"], cols=out_p)
    b2 = _pad2d(params["b2"], cols=out_p)

    vmem = pl.BlockSpec(memory_space=pltpu.MemorySpace.VMEM)
    emb_p, logits_p = pl.pallas_call(
        gat_fused_kernel,
        out_shape=(jax.ShapeDtypeStruct((n, hid_p), jnp.float32),
                   jax.ShapeDtypeStruct((n, out_p), jnp.float32)),
        in_specs=[vmem] * 11,
        out_specs=(vmem, vmem),
    )(x_p, adj, mask, w1, as1, ad1, b1, w2, as2, ad2, b2)

    return emb_p[:, :hid], logits_p[:, :out]


# ---------------------------------------------------------------------------
# Parameter init (deterministic, glorot-uniform like PyG)
# ---------------------------------------------------------------------------
def _glorot(key, shape):
    fan_in, fan_out = shape
    limit = (6.0 / (fan_in + fan_out)) ** 0.5
    return jax.random.uniform(key, shape, jnp.float32, -limit, limit)


def init_gat_params(key, feat_dim, hid_dim, out_dim):
    k = jax.random.split(key, 6)
    return {
        "w1": _glorot(k[0], (feat_dim, hid_dim)),
        "att_src1": _glorot(k[1], (1, hid_dim)),
        "att_dst1": _glorot(k[2], (1, hid_dim)),
        "b1": jnp.zeros((1, hid_dim), jnp.float32),
        "w2": _glorot(k[3], (hid_dim, out_dim)),
        "att_src2": _glorot(k[4], (1, out_dim)),
        "att_dst2": _glorot(k[5], (1, out_dim)),
        "b2": jnp.zeros((1, out_dim), jnp.float32),
    }


if __name__ == "__main__":
    # small shapes implied by the module: N nodes, feat -> hid -> out
    N, FEAT, HID, OUT = 16, 16, 32, 8
    DROPOUT = 0.5
    NUM_EDGES = 40

    key = jax.random.PRNGKey(0)
    kx, ks, kd, kp, kdrop = jax.random.split(key, 5)

    x = jax.random.normal(kx, (N, FEAT), jnp.float32)
    src = jax.random.randint(ks, (NUM_EDGES,), 0, N, dtype=jnp.int32)
    dst = jax.random.randint(kd, (NUM_EDGES,), 0, N, dtype=jnp.int32)
    edge_index = jnp.stack([src, dst], axis=0)                   # [2, E]

    params = init_gat_params(kp, FEAT, HID, OUT)

    embedding, logits = gat_forward(params, x, edge_index, DROPOUT, kdrop)
    jax.block_until_ready((embedding, logits))

    assert embedding.shape == (N, HID) and logits.shape == (N, OUT)
    assert bool(jnp.all(jnp.isfinite(embedding))) and bool(
        jnp.all(jnp.isfinite(logits)))
    print("KERNEL_OK")
</pallas_src>

<mosaic_0001>
module attributes {stable_mosaic.version = 11 : i64} {
  func.func @gat_fused_kernel(%arg0: memref<16x128xf32, #tpu.memory_space<vmem>>, %arg1: memref<16x16xf32, #tpu.memory_space<vmem>>, %arg2: memref<16x128xf32, #tpu.memory_space<vmem>>, %arg3: memref<128x128xf32, #tpu.memory_space<vmem>>, %arg4: memref<1x128xf32, #tpu.memory_space<vmem>>, %arg5: memref<1x128xf32, #tpu.memory_space<vmem>>, %arg6: memref<1x128xf32, #tpu.memory_space<vmem>>, %arg7: memref<128x128xf32, #tpu.memory_space<vmem>>, %arg8: memref<1x128xf32, #tpu.memory_space<vmem>>, %arg9: memref<1x128xf32, #tpu.memory_space<vmem>>, %arg10: memref<1x128xf32, #tpu.memory_space<vmem>>, %arg11: memref<16x128xf32, #tpu.memory_space<vmem>>, %arg12: memref<16x128xf32, #tpu.memory_space<vmem>>) attributes {dimension_semantics = [], scalar_prefetch = 0 : i64, scratch_operands = 0 : i64, tpu.core_type = #tpu.core_type<tc>} {
    %c0 = arith.constant 0 : index
    %c0_0 = arith.constant 0 : index
    %0 = vector.load %arg1[%c0, %c0_0] : memref<16x16xf32, #tpu.memory_space<vmem>>, vector<16x16xf32>
    %cst = arith.constant 0.000000e+00 : f32
    %1 = vector.broadcast %cst : f32 to vector<16x16xf32>
    %2 = arith.cmpf ogt, %0, %1 : vector<16x16xf32>
    %c0_1 = arith.constant 0 : index
    %c0_2 = arith.constant 0 : index
    %3 = vector.load %arg0[%c0_1, %c0_2] : memref<16x128xf32, #tpu.memory_space<vmem>>, vector<16x128xf32>
    %c0_3 = arith.constant 0 : index
    %c0_4 = arith.constant 0 : index
    %4 = vector.load %arg3[%c0_3, %c0_4] : memref<128x128xf32, #tpu.memory_space<vmem>>, vector<128x128xf32>
    %c0_5 = arith.constant 0 : index
    %c0_6 = arith.constant 0 : index
    %5 = vector.load %arg4[%c0_5, %c0_6] : memref<1x128xf32, #tpu.memory_space<vmem>>, vector<1x128xf32>
    %c0_7 = arith.constant 0 : index
    %c0_8 = arith.constant 0 : index
    %6 = vector.load %arg5[%c0_7, %c0_8] : memref<1x128xf32, #tpu.memory_space<vmem>>, vector<1x128xf32>
    %c0_9 = arith.constant 0 : index
    %c0_10 = arith.constant 0 : index
    %7 = vector.load %arg6[%c0_9, %c0_10] : memref<1x128xf32, #tpu.memory_space<vmem>>, vector<1x128xf32>
    %8 = arith.truncf %3 : vector<16x128xf32> to vector<16x128xbf16>
    %9 = arith.truncf %4 : vector<128x128xf32> to vector<128x128xbf16>
    %cst_11 = arith.constant dense<0.000000e+00> : vector<16x128xf32>
    %10 = tpu.matmul %8, %9, %cst_11 {dimension_numbers = #tpu.dot_dimension_numbers<[1], [0], [0], [1], [0, 0, 1, 1], [], []>} : vector<16x128xbf16>, vector<128x128xbf16>, vector<16x128xf32> -> vector<16x128xf32>
    %11 = vector.broadcast %6 : vector<1x128xf32> to vector<16x128xf32>
    %12 = arith.mulf %10, %11 : vector<16x128xf32>
    %cst_12 = arith.constant dense<0.000000e+00> : vector<16xf32>
    %13 = vector.multi_reduction <add>, %12, %cst_12 [1] : vector<16x128xf32> to vector<16xf32>
    %14 = vector.shape_cast %13 : vector<16xf32> to vector<16x1xf32>
    %15 = vector.broadcast %5 : vector<1x128xf32> to vector<16x128xf32>
    %16 = arith.mulf %10, %15 : vector<16x128xf32>
    %cst_13 = arith.constant dense<0.000000e+00> : vector<16xf32>
    %17 = vector.multi_reduction <add>, %16, %cst_13 [1] : vector<16x128xf32> to vector<16xf32>
    %18 = vector.shape_cast %17 : vector<16xf32> to vector<16x1xf32>
    %19 = tpu.transpose %18, [1, 0] : vector<16x1xf32> -> vector<1x16xf32>
    %20 = vector.broadcast %14 : vector<16x1xf32> to vector<16x16xf32>
    %21 = vector.broadcast %19 : vector<1x16xf32> to vector<16x16xf32>
    %22 = arith.addf %20, %21 : vector<16x16xf32>
    %cst_14 = arith.constant 0.000000e+00 : f32
    %23 = vector.broadcast %cst_14 : f32 to vector<16x16xf32>
    %24 = arith.cmpf ogt, %22, %23 : vector<16x16xf32>
    %cst_15 = arith.constant 2.000000e-01 : f32
    %25 = vector.broadcast %cst_15 : f32 to vector<16x16xf32>
    %26 = arith.mulf %25, %22 : vector<16x16xf32>
    %27 = arith.select %24, %22, %26 : vector<16x16xi1>, vector<16x16xf32>
    %cst_16 = arith.constant -1.000000e+30 : f32
    %28 = vector.broadcast %cst_16 : f32 to vector<16x16xf32>
    %29 = arith.select %2, %27, %28 : vector<16x16xi1>, vector<16x16xf32>
    %cst_17 = arith.constant dense<0xFF800000> : vector<16xf32>
    %30 = vector.multi_reduction <maximumf>, %29, %cst_17 [1] : vector<16x16xf32> to vector<16xf32>
    %31 = vector.shape_cast %30 : vector<16xf32> to vector<16x1xf32>
    %32 = vector.broadcast %31 : vector<16x1xf32> to vector<16x16xf32>
    %33 = arith.subf %29, %32 : vector<16x16xf32>
    %34 = math.exp %33 : vector<16x16xf32>
    %cst_18 = arith.constant dense<0.000000e+00> : vector<16xf32>
    %35 = vector.multi_reduction <add>, %34, %cst_18 [1] : vector<16x16xf32> to vector<16xf32>
    %36 = vector.shape_cast %35 : vector<16xf32> to vector<16x1xf32>
    %37 = arith.truncf %34 : vector<16x16xf32> to vector<16x16xbf16>
    %38 = arith.truncf %10 : vector<16x128xf32> to vector<16x128xbf16>
    %cst_19 = arith.constant dense<0.000000e+00> : vector<16x128xf32>
    %39 = tpu.matmul %37, %38, %cst_19 {dimension_numbers = #tpu.dot_dimension_numbers<[1], [0], [0], [1], [0, 0, 1, 1], [], []>} : vector<16x16xbf16>, vector<16x128xbf16>, vector<16x128xf32> -> vector<16x128xf32>
    %cst_20 = arith.constant 1.000000e+00 : f32
    %40 = vector.broadcast %cst_20 : f32 to vector<16x1xf32>
    %41 = arith.divf %40, %36 : vector<16x1xf32>
    %42 = vector.broadcast %41 : vector<16x1xf32> to vector<16x128xf32>
    %43 = arith.mulf %39, %42 : vector<16x128xf32>
    %44 = vector.broadcast %7 : vector<1x128xf32> to vector<16x128xf32>
    %45 = arith.addf %43, %44 : vector<16x128xf32>
    %cst_21 = arith.constant 0.000000e+00 : f32
    %46 = vector.broadcast %cst_21 : f32 to vector<16x128xf32>
    %47 = arith.maximumf %45, %46 : vector<16x128xf32>
    %c0_22 = arith.constant 0 : index
    %c0_23 = arith.constant 0 : index
    %48 = vector.load %arg2[%c0_22, %c0_23] : memref<16x128xf32, #tpu.memory_space<vmem>>, vector<16x128xf32>
    %49 = arith.mulf %47, %48 : vector<16x128xf32>
    %50 = arith.mulf %49, %49 : vector<16x128xf32>
    %cst_24 = arith.constant dense<0.000000e+00> : vector<16xf32>
    %51 = vector.multi_reduction <add>, %50, %cst_24 [1] : vector<16x128xf32> to vector<16xf32>
    %52 = vector.shape_cast %51 : vector<16xf32> to vector<16x1xf32>
    %cst_25 = arith.constant 1.000000e-24 : f32
    %53 = vector.broadcast %cst_25 : f32 to vector<16x1xf32>
    %54 = arith.maximumf %52, %53 : vector<16x1xf32>
    %55 = math.rsqrt %54 : vector<16x1xf32>
    %56 = vector.broadcast %55 : vector<16x1xf32> to vector<16x128xf32>
    %57 = arith.mulf %49, %56 : vector<16x128xf32>
    %c0_26 = arith.constant 0 : index
    %c0_27 = arith.constant 0 : index
    %58 = vector.load %arg11[%c0_26, %c0_27] : memref<16x128xf32, #tpu.memory_space<vmem>>, vector<16x128xf32>
    tpu.vector_store %arg11[%c0_26, %c0_27], %57 {strides = array<i32>} : memref<16x128xf32, #tpu.memory_space<vmem>>, vector<16x128xf32>,
    %c0_28 = arith.constant 0 : index
    %c0_29 = arith.constant 0 : index
    %59 = vector.load %arg7[%c0_28, %c0_29] : memref<128x128xf32, #tpu.memory_space<vmem>>, vector<128x128xf32>
    %c0_30 = arith.constant 0 : index
    %c0_31 = arith.constant 0 : index
    %60 = vector.load %arg8[%c0_30, %c0_31] : memref<1x128xf32, #tpu.memory_space<vmem>>, vector<1x128xf32>
    %c0_32 = arith.constant 0 : index
    %c0_33 = arith.constant 0 : index
    %61 = vector.load %arg9[%c0_32, %c0_33] : memref<1x128xf32, #tpu.memory_space<vmem>>, vector<1x128xf32>
    %c0_34 = arith.constant 0 : index
    %c0_35 = arith.constant 0 : index
    %62 = vector.load %arg10[%c0_34, %c0_35] : memref<1x128xf32, #tpu.memory_space<vmem>>, vector<1x128xf32>
    %63 = arith.truncf %57 : vector<16x128xf32> to vector<16x128xbf16>
    %64 = arith.truncf %59 : vector<128x128xf32> to vector<128x128xbf16>
    %cst_36 = arith.constant dense<0.000000e+00> : vector<16x128xf32>
    %65 = tpu.matmul %63, %64, %cst_36 {dimension_numbers = #tpu.dot_dimension_numbers<[1], [0], [0], [1], [0, 0, 1, 1], [], []>} : vector<16x128xbf16>, vector<128x128xbf16>, vector<16x128xf32> -> vector<16x128xf32>
    %66 = vector.broadcast %61 : vector<1x128xf32> to vector<16x128xf32>
    %67 = arith.mulf %65, %66 : vector<16x128xf32>
    %cst_37 = arith.constant dense<0.000000e+00> : vector<16xf32>
    %68 = vector.multi_reduction <add>, %67, %cst_37 [1] : vector<16x128xf32> to vector<16xf32>
    %69 = vector.shape_cast %68 : vector<16xf32> to vector<16x1xf32>
    %70 = vector.broadcast %60 : vector<1x128xf32> to vector<16x128xf32>
    %71 = arith.mulf %65, %70 : vector<16x128xf32>
    %cst_38 = arith.constant dense<0.000000e+00> : vector<16xf32>
    %72 = vector.multi_reduction <add>, %71, %cst_38 [1] : vector<16x128xf32> to vector<16xf32>
    %73 = vector.shape_cast %72 : vector<16xf32> to vector<16x1xf32>
    %74 = tpu.transpose %73, [1, 0] : vector<16x1xf32> -> vector<1x16xf32>
    %75 = vector.broadcast %69 : vector<16x1xf32> to vector<16x16xf32>
    %76 = vector.broadcast %74 : vector<1x16xf32> to vector<16x16xf32>
    %77 = arith.addf %75, %76 : vector<16x16xf32>
    %cst_39 = arith.constant 0.000000e+00 : f32
    %78 = vector.broadcast %cst_39 : f32 to vector<16x16xf32>
    %79 = arith.cmpf ogt, %77, %78 : vector<16x16xf32>
    %cst_40 = arith.constant 2.000000e-01 : f32
    %80 = vector.broadcast %cst_40 : f32 to vector<16x16xf32>
    %81 = arith.mulf %80, %77 : vector<16x16xf32>
    %82 = arith.select %79, %77, %81 : vector<16x16xi1>, vector<16x16xf32>
    %cst_41 = arith.constant -1.000000e+30 : f32
    %83 = vector.broadcast %cst_41 : f32 to vector<16x16xf32>
    %84 = arith.select %2, %82, %83 : vector<16x16xi1>, vector<16x16xf32>
    %cst_42 = arith.constant dense<0xFF800000> : vector<16xf32>
    %85 = vector.multi_reduction <maximumf>, %84, %cst_42 [1] : vector<16x16xf32> to vector<16xf32>
    %86 = vector.shape_cast %85 : vector<16xf32> to vector<16x1xf32>
    %87 = vector.broadcast %86 : vector<16x1xf32> to vector<16x16xf32>
    %88 = arith.subf %84, %87 : vector<16x16xf32>
    %89 = math.exp %88 : vector<16x16xf32>
    %cst_43 = arith.constant dense<0.000000e+00> : vector<16xf32>
    %90 = vector.multi_reduction <add>, %89, %cst_43 [1] : vector<16x16xf32> to vector<16xf32>
    %91 = vector.shape_cast %90 : vector<16xf32> to vector<16x1xf32>
    %92 = arith.truncf %89 : vector<16x16xf32> to vector<16x16xbf16>
    %93 = arith.truncf %65 : vector<16x128xf32> to vector<16x128xbf16>
    %cst_44 = arith.constant dense<0.000000e+00> : vector<16x128xf32>
    %94 = tpu.matmul %92, %93, %cst_44 {dimension_numbers = #tpu.dot_dimension_numbers<[1], [0], [0], [1], [0, 0, 1, 1], [], []>} : vector<16x16xbf16>, vector<16x128xbf16>, vector<16x128xf32> -> vector<16x128xf32>
    %cst_45 = arith.constant 1.000000e+00 : f32
    %95 = vector.broadcast %cst_45 : f32 to vector<16x1xf32>
    %96 = arith.divf %95, %91 : vector<16x1xf32>
    %97 = vector.broadcast %96 : vector<16x1xf32> to vector<16x128xf32>
    %98 = arith.mulf %94, %97 : vector<16x128xf32>
    %99 = vector.broadcast %62 : vector<1x128xf32> to vector<16x128xf32>
    %100 = arith.addf %98, %99 : vector<16x128xf32>
    %c0_46 = arith.constant 0 : index
    %c0_47 = arith.constant 0 : index
    %101 = vector.load %arg12[%c0_46, %c0_47] : memref<16x128xf32, #tpu.memory_space<vmem>>, vector<16x128xf32>
    tpu.vector_store %arg12[%c0_46, %c0_47], %100 {strides = array<i32>} : memref<16x128xf32, #tpu.memory_space<vmem>>, vector<16x128xf32>,
    return
  }
}

</mosaic_0001>

<bundles_post_ra>
// kernel: tpu_custom_call.1
= control target key start
LH: loop header
LB: loop body
LE: loop exit
PB: predicated region body
PF: predicated region fallthrough
CT: control target
= control target key end

     0   :  { %18 = vsyncpa [#allocation3], 0  ;;  %s1065_s0 = inlined_call_operand.hbm [shape: f32[16,128], index: 0, kind: input, shape index: {}]   ;;  %s1066_s1 = inlined_call_operand.hbm [shape: f32[16,16], index: 1, kind: input, shape index: {}]   ;;  %s1067_s2 = inlined_call_operand.hbm [shape: f32[16,128], index: 2, kind: input, shape index: {}]   ;;  %s1068_s3 = inlined_call_operand.hbm [shape: f32[128,128], index: 3, kind: input, shape index: {}]   ;;  %s1069_s4 = inlined_call_operand.vmem [shape: f32[1,128], index: 4, kind: input, shape index: {}]   ;;  %s1070_s5 = inlined_call_operand.vmem [shape: f32[1,128], index: 5, kind: input, shape index: {}]   ;;  %s1071_s6 = inlined_call_operand.vmem [shape: f32[1,128], index: 6, kind: input, shape index: {}]   ;;  %s1072_s7 = inlined_call_operand.hbm [shape: f32[128,128], index: 7, kind: input, shape index: {}]   ;;  %s1073_s8 = inlined_call_operand.vmem [shape: f32[1,128], index: 8, kind: input, shape index: {}]   ;;  %s1074_s9 = inlined_call_operand.vmem [shape: f32[1,128], index: 9, kind: input, shape index: {}]   ;;  %s1075_s10 = inlined_call_operand.vmem [shape: f32[1,128], index: 10, kind: input, shape index: {}]   ;;  %s1076_s11 = inlined_call_operand.hbm [shape: f32[16,128], index: 11, kind: output, shape index: {0}]   ;;  %s1077_s12 = inlined_call_operand.hbm [shape: f32[16,128], index: 12, kind: output, shape index: {1}]  }
   0x1   :  { %19 = vsyncpa [#allocation6], 0 }
   0x2   :  { %20 = vsyncpa [#allocation9], 0 }
   0x3   :  { %21 = vsyncpa [#allocation4], 0 }
   0x4   :  { %22 = vsyncpa [#allocation13], 0  ;;  %s872_s21 = smov [#allocation5]   ;;  %s873_s23 = smov [#allocation8]  }
   0x5   :  { %s40_s22 = sshll.u32 %s872_s21, 4  ;;  %s64_s24 = sshll.u32 %s873_s23, 4  ;;  %s41_s22 = int_to_ptr.vmem [resolvable:$true] %s40_s22  ;;  %s65_s24 = int_to_ptr.vmem [resolvable:$true] %s64_s24 }
   0x6   :  { %s730_s25 = scalar_lea.vmem %s41_s22, 256  ;;  %p735_p1 = scmp.lt.s32.totalorder %s41_s22, %s41_s22 }
   0x7   :  { %p731_p0 = scmp.ne.s32.totalorder %s41_s22, %s730_s25  ;;  %p736_p2 = scmp.lt.s32.totalorder %s730_s25, %s730_s25 }
   0x9   :  { %p737_p3 = por %p736_p2, %p735_p1 }
   0xb   :  { %p738_p4 = pnand %p737_p3, %p731_p0 }
   0xd   :  { %741 = shalt.err (!%p738_p4)
}
   0xe   :  { %s874_s26 = smov 128   ;;  %s875_s27 = smov 8  }
   0xf   :  { %46 = dma.hbm_to_vmem [thread:$0]  %s1066_s1, 256, %s41_s22, [#allocation6], %s874_s26, %s874_s26, %s875_s27  }
  0x10   :  { %s750_s30 = scalar_lea.vmem %s65_s24, 2048  ;;  %p755_p6 = scmp.lt.s32.totalorder %s65_s24, %s65_s24 }
  0x11   :  { %p751_p5 = scmp.ne.s32.totalorder %s65_s24, %s750_s30  ;;  %p756_p7 = scmp.lt.s32.totalorder %s750_s30, %s750_s30 }
  0x13   :  { %p757_p8 = por %p756_p7, %p755_p6 }
  0x15   :  { %p758_p9 = pnand %p757_p8, %p751_p5 }
  0x17   :  { %761 = shalt.err (!%p758_p9)
}
  0x18   :  { %70 = dma.hbm_to_vmem [thread:$0]  %s1068_s3, 2048, %s65_s24, [#allocation9], %s874_s26, %s874_s26, %s875_s27  }
  0x19   :  { %s876_s15 = smov [#allocation2]   ;;  %s877_s17 = smov [#allocation7]  }
  0x1a   :  { %s28_s16 = sshll.u32 %s876_s15, 4  ;;  %s52_s18 = sshll.u32 %s877_s17, 4  ;;  %s29_s16 = int_to_ptr.vmem [resolvable:$true] %s28_s16  ;;  %s53_s18 = int_to_ptr.vmem [resolvable:$true] %s52_s18 }
  0x1b   :  { %s770_s1 = scalar_lea.vmem %s29_s16, 256  ;;  %p775_p11 = scmp.lt.s32.totalorder %s29_s16, %s29_s16 }
  0x1c   :  { %p771_p10 = scmp.ne.s32.totalorder %s29_s16, %s770_s1  ;;  %p776_p12 = scmp.lt.s32.totalorder %s770_s1, %s770_s1 }
  0x1e   :  { %p777_p13 = por %p776_p12, %p775_p11 }
  0x20   :  { %p778_p0 = pnand %p777_p13, %p771_p10 }
  0x22   :  { %781 = shalt.err (!%p778_p0)
}
  0x23   :  { %34 = dma.hbm_to_vmem [thread:$0]  %s1065_s0, 256, %s29_s16, [#allocation3], %s874_s26, %s874_s26, %s875_s27  }
  0x24   :  { %s790_s3 = scalar_lea.vmem %s53_s18, 256  ;;  %p795_p2 = scmp.lt.s32.totalorder %s53_s18, %s53_s18 }
  0x25   :  { %p791_p1 = scmp.ne.s32.totalorder %s53_s18, %s790_s3  ;;  %p796_p3 = scmp.lt.s32.totalorder %s790_s3, %s790_s3 }
  0x27   :  { %p797_p4 = por %p796_p3, %p795_p2 }
  0x29   :  { %p798_p5 = pnand %p797_p4, %p791_p1 }
  0x2b   :  { %801 = shalt.err (!%p798_p5)
}
  0x2c   :  { %58 = dma.hbm_to_vmem [thread:$0]  %s1067_s2, 256, %s53_s18, [#allocation6], %s874_s26, %s874_s26, %s875_s27  }
  0x2d   :  { %s878_s23 = smov [#allocation10]  }
  0x2e   :  { %s82_s24 = sshll.u32 %s878_s23, 4  ;;  %s83_s24 = int_to_ptr.vmem [resolvable:$true] %s82_s24 }
  0x2f   :  { %s810_s25 = scalar_lea.vmem %s83_s24, 2048  ;;  %p815_p7 = scmp.lt.s32.totalorder %s83_s24, %s83_s24 }
  0x30   :  { %p811_p6 = scmp.ne.s32.totalorder %s83_s24, %s810_s25  ;;  %p816_p8 = scmp.lt.s32.totalorder %s810_s25, %s810_s25 }
  0x32   :  { %p817_p9 = por %p816_p8, %p815_p7 }
  0x34   :  { %p818_p10 = pnand %p817_p9, %p811_p6 }
  0x36   :  { %821 = shalt.err (!%p818_p10)
}
  0x37   :  { %88 = dma.hbm_to_vmem [thread:$0]  %s1072_s7, 2048, %s83_s24, [#allocation9], %s874_s26, %s874_s26, %s875_s27  }
  0x38   :  { %862 = dma.done.wait [#allocation3], 256  }
  0x39   :  { %863 = vsyncadd [#allocation3], 4294967040 }
  0x3a   :  { %864 = dma.done.wait [#allocation6], 512  }
  0x3b   :  { %865 = vsyncadd [#allocation6], 4294966784 }
  0x3c   :  { %866 = dma.done.wait [#allocation9], 4096  }
  0x3d   :  { %867 = vsyncadd [#allocation9], 4294963200  ;;  %v879_v0 = vmov 0.0   ;;  %vm880_vm0 = vmmov 0   ;;  %v131_v1 = vld [vmem:[#allocation8 + $0x70] sm:$0xff]  ;;  %v132_v2 = vld [vmem:[#allocation8 + $0x78] sm:$0xff]  ;;  %v242_v41 = vlaneseq }
  0x3e   :  { %639 = vmatprep.subr.bf16.mxu0 %v879_v0  ;;  %655 = vmatprep.mubr.msk.bf16.mxu0 %vm880_vm0, %v879_v0  ;;  %v129_v3 = vld [vmem:[#allocation8 + $0x60] sm:$0xff]  ;;  %v144_v4 = vpack.c.bf16 %v132_v2, %v131_v1  ;;  %v130_v5 = vld [vmem:[#allocation8 + $0x68] sm:$0xff]  ;;  %v127_v7 = vld [vmem:[#allocation8 + $0x50] sm:$0xff]  ;;  %vm256_vm4 = vcmask 130048  }
  0x3f   :  { %659 = vmatprep.subr.bf16.mxu1 %v879_v0  ;;  %661 = vmatprep.mubr.msk.bf16.mxu1 %vm880_vm0, %v879_v0  ;;  %v143_v6 = vpack.c.bf16 %v130_v5, %v129_v3  ;;  %v128_v8 = vld [vmem:[#allocation8 + $0x58] sm:$0xff]  ;;  %v125_v10 = vld [vmem:[#allocation8 + $0x40] sm:$0xff]  ;;  %v126_v11 = vld [vmem:[#allocation8 + $0x48] sm:$0xff]  ;;  %v1001_v42 = vshrl.u32 %v242_v41, 7 }
  0x40   :  { %640 = vmatpush3.bf16.msra.mxu0 %v144_v4  ;;  %v142_v9 = vpack.c.bf16 %v128_v8, %v127_v7  ;;  %v141_v12 = vpack.c.bf16 %v126_v11, %v125_v10  ;;  %v123_v13 = vld [vmem:[#allocation8 + $0x30] sm:$0xff]  ;;  %v124_v14 = vld [vmem:[#allocation8 + $0x38] sm:$0xff]  ;;  %v121_v16 = vld [vmem:[#allocation8 + $0x20] sm:$0xff] }
  0x41   :  { %641 = vmatprep.subr.bf16.mxu0 %v879_v0  ;;  %v140_v15 = vpack.c.bf16 %v124_v14, %v123_v13  ;;  %v122_v17 = vld [vmem:[#allocation8 + $0x28] sm:$0xff]  ;;  %v119_v19 = vld [vmem:[#allocation8 + $0x10] sm:$0xff]  ;;  %v120_v20 = vld [vmem:[#allocation8 + $0x18] sm:$0xff]  ;;  %v244_v44 = vsub.s32 0, %v1001_v42 }
  0x42   :  { %v139_v18 = vpack.c.bf16 %v122_v17, %v121_v16  ;;  %v138_v21 = vpack.c.bf16 %v120_v20, %v119_v19  ;;  %v117_v22 = vld [vmem:[#allocation8] sm:$0xff]  ;;  %v118_v23 = vld [vmem:[#allocation8 + $0x8] sm:$0xff]  ;;  %v115_v25 = vld [vmem:[#allocation2] sm:$0xff] }
  0x43   :  { %v137_v24 = vpack.c.bf16 %v118_v23, %v117_v22  ;;  %v116_v26 = vld [vmem:[#allocation2 + $0x8] sm:$0xff]  ;;  %v610_v28 = vld [vmem:[%s1069_s4] ss:$0 sm:$0xff]  ;;  %v1006_v47 = vld [vmem:[#allocation5] sm:$0xff] }
  0x44   :  { %642 = vmatpush3.bf16.msra.mxu0 %v143_v6  ;;  %v136_v27 = vpack.c.bf16 %v116_v26, %v115_v25  ;;  %v609_v29 = vld [vmem:[%s1070_s5] ss:$0 sm:$0xff]  ;;  %vm113_vm1 = vcmp.gt.f32.partialorder %v1006_v47, 0.0  ;;  %v1009_v51 = vld [vmem:[#allocation5 + $0x8] sm:$0xff]  ;;  %v367_v10 = vld [vmem:[#allocation10 + $0x60] sm:$0xff] }
  0x45   :  { %643 = vmatprep.subr.bf16.mxu0 %v879_v0  ;;  %vm114_vm5 = vcmp.gt.f32.partialorder %v1009_v51, 0.0  ;;  %v369_v8 = vld [vmem:[#allocation10 + $0x70] sm:$0xff] }
  0x46   :  { %v612_v17 = vld [vmem:[%s1071_s6] ss:$0 sm:$0xff] }
  0x47   :  { %v361_v41 = vld [vmem:[#allocation10 + $0x30] sm:$0xff] }
  0x48   :  { %644 = vmatpush3.bf16.msra.mxu0 %v142_v9  ;;  %v370_v9 = vld [vmem:[#allocation10 + $0x78] sm:$0xff] }
  0x49   :  { %645 = vmatprep.subr.bf16.mxu0 %v879_v0  ;;  %v382_v11 = vpack.c.bf16 %v370_v9, %v369_v8 }
  0x4c   :  { %646 = vmatpush3.bf16.msra.mxu0 %v141_v12  ;;  %v368_v12 = vld [vmem:[#allocation10 + $0x68] sm:$0xff] }
  0x4d   :  { %647 = vmatprep.subr.bf16.mxu0 %v879_v0  ;;  %v381_v13 = vpack.c.bf16 %v368_v12, %v367_v10  ;;  %v613_v10 = vld [vmem:[%s1074_s9] ss:$0 sm:$0xff] }
  0x50   :  { %648 = vmatpush3.bf16.msra.mxu0 %v140_v15 }
  0x51   :  { %649 = vmatprep.subr.bf16.mxu0 %v879_v0 }
  0x54   :  { %650 = vmatpush3.bf16.msra.mxu0 %v139_v18 }
  0x55   :  { %651 = vmatprep.subr.bf16.mxu0 %v879_v0 }
  0x58   :  { %652 = vmatpush3.bf16.msra.mxu0 %v138_v21 }
  0x59   :  { %653 = vmatprep.subr.bf16.mxu0 %v879_v0 }
  0x5c   :  { %654 = vmatpush3.bf16.msra.mxu0 %v137_v24  ;;  %v337_v24 = vld [vmem:[#allocation7] sm:$0xff] }
  0x5d   :  { %685 = vmatprep.subr.bf16.mxu0 %v879_v0 }
  0x5f   :  { %656 = vmatmul.mubr.bf16.vlgmr.msra.gmra.mxu0 %v136_v27 }
  0x60   :  { %687 = vmatprep.mubr.msk.bf16.mxu0 %vm880_vm0, %v879_v0 }
 0x11f   :  { %v179_v30 = vpop.f32.mrf.mxu0 }
 0x120   :  { %v204_v31 = vmul.f32 %v610_v28, %v179_v30  ;;  %v192_v32 = vmul.f32 %v609_v29, %v179_v30 }
 0x121   :  { %v657_v33 = vpop.f32.mrf.mxu0 }
 0x122   :  { %206 = vadd.xlane.f32.xlu0 %v204_v31  ;;  %194 = vadd.xlane.f32.xlu1 %v192_v32 }
 0x123   :  { %v182_v34 = vpop.f32.mrf.mxu0 }
 0x124   :  { %v276_v35 = vpack.c.bf16 %v182_v34, %v179_v30  ;;  %v205_v36 = vmul.f32 %v610_v28, %v182_v34  ;;  %v193_v37 = vmul.f32 %v609_v29, %v182_v34  ;;  %v338_v30 = vld [vmem:[#allocation7 + $0x8] sm:$0xff] }
 0x125   :  { %v658_v38 = vpop.f32.mrf.mxu0 }
 0x126   :  { %660 = vmatpush3.bf16.msra.mxu1 %v276_v35  ;;  %208 = vadd.xlane.f32.xlu0 %v205_v36  ;;  %v365_v35 = vld [vmem:[#allocation10 + $0x50] sm:$0xff]  ;;  %v366_v36 = vld [vmem:[#allocation10 + $0x58] sm:$0xff]  ;;  %v363_v38 = vld [vmem:[#allocation10 + $0x40] sm:$0xff] }
 0x127   :  { %196 = vadd.xlane.f32.xlu1 %v193_v37  ;;  %665 = vmatprep.subr.bf16.mxu1 %v879_v0  ;;  %v380_v37 = vpack.c.bf16 %v366_v36, %v365_v35 }
 0x1ab   :  { %v207_v39 = vpop.xlane.xlu0 %206  ;;  %v195_v43 = vpop.xlane.xlu1 %194 }
 0x1ac   :  { %210 = vxpose.xlu0.b32.start [1/2] (short) (narrow) %v207_v39, 8  ;;  %v364_v39 = vld [vmem:[#allocation10 + $0x48] sm:$0xff] }
 0x1af   :  { %v209_v40 = vpop.xlane.xlu0 %208 }
 0x1b0   :  { %211 = vxpose.xlu0.b32.end [2/2] (short) (narrow) %v209_v40, 8  ;;  %v197_v48 = vpop.xlane.xlu1 %196  ;;  %v379_v40 = vpack.c.bf16 %v364_v39, %v363_v38 }
 0x228   :  { %v226_v45 = vpop.trf.xlu0 }
 0x229   :  { %v245_v46 = vrot.slane %v226_v45, %v244_v44 }
 0x22b   :  { %v246_v49 = vadd.f32 %v245_v46, %v195_v43  ;;  %v247_v50 = vadd.f32 %v245_v46, %v197_v48  ;;  %v362_v43 = vld [vmem:[#allocation10 + $0x38] sm:$0xff]  ;;  %v359_v46 = vld [vmem:[#allocation10 + $0x20] sm:$0xff]  ;;  %v360_v48 = vld [vmem:[#allocation10 + $0x28] sm:$0xff] }
 0x22c   :  { %v378_v45 = vpack.c.bf16 %v362_v43, %v361_v41 }
 0x22d   :  { %vm248_vm2 = vcmp.gt.f32.partialorder %v246_v49, 0.0  ;;  %v250_v52 = vmul.f32 0.2, %v246_v49  ;;  %vm249_vm3 = vcmp.gt.f32.partialorder %v247_v50, 0.0  ;;  %v251_v53 = vmul.f32 0.2, %v247_v50 }
 0x22f   :  { %v252_v54 = vsel %vm248_vm2, %v246_v49, %v250_v52  ;;  %v253_v55 = vsel %vm249_vm3, %v247_v50, %v251_v53  ;;  %v377_v49 = vpack.c.bf16 %v360_v48, %v359_v46  ;;  %v357_v50 = vld [vmem:[#allocation10 + $0x10] sm:$0xff]  ;;  %v358_v52 = vld [vmem:[#allocation10 + $0x18] sm:$0xff] }
 0x230   :  { %v254_v56 = vsel %vm113_vm1, %v252_v54, -1e+30  ;;  %v255_v58 = vsel %vm114_vm5, %v253_v55, -1e+30  ;;  %v376_v53 = vpack.c.bf16 %v358_v52, %v357_v50  ;;  %v355_v54 = vld [vmem:[#allocation10] sm:$0xff]  ;;  %v356_v55 = vld [vmem:[#allocation10 + $0x8] sm:$0xff] }
 0x231   :  { %v257_v57 = vsel %vm256_vm4, %v254_v56, -inf  ;;  %v260_v59 = vsel %vm256_vm4, %v255_v58, -inf }
 0x232   :  { %258 = vmax.xlane.f32.xlu1 %v257_v57 }
 0x236   :  { %261 = vmax.xlane.f32.xlu1 %v260_v59 }
 0x2bb   :  { %v259_v60 = vpop.xlane.xlu1 %258 }
 0x2bc   :  { %v263_v61 = vsub.f32 %v254_v56, %v259_v60  ;;  %v375_v56 = vpack.c.bf16 %v356_v55, %v355_v54 }
 0x2be   :  { %v265_v62 = vmul.f32 1.442695, %v263_v61 }
 0x2bf   :  { %v262_v63 = vpop.xlane.xlu1 %261 }
 0x2c0   :  { %702 = vpow2.f32 %v265_v62  ;;  %v264_v1 = vsub.f32 %v255_v58, %v262_v63 }
 0x2c2   :  { %v267_v2 = vmul.f32 1.442695, %v264_v1 }
 0x2c4   :  { %704 = vpow2.f32 %v267_v2 }
 0x2cd   :  { %v703_v3 = vpop.eup %702 }
 0x2ce   :  { %v269_v4 = vsel %vm256_vm4, %v703_v3, 0.0 }
 0x2cf   :  { %270 = vadd.xlane.f32.xlu1 %v269_v4 }
 0x2d1   :  { %v705_v5 = vpop.eup %704 }
 0x2d2   :  { %v272_v6 = vsel %vm256_vm4, %v705_v5, 0.0  ;;  %v275_v7 = vpack.c.bf16 %v705_v5, %v703_v3  ;;  %v614_v3 = vld [vmem:[%s1073_s8] ss:$0 sm:$0xff]  ;;  %s881_s8 = smov [#allocation11]  }
 0x2d3   :  { %273 = vadd.xlane.f32.xlu1 %v272_v6  ;;  %s579_s9 = sshll.u32 %s881_s8, 4  ;;  %s580_s9 = int_to_ptr.vmem [resolvable:$true] %s579_s9 }
 0x2d4   :  { %662 = vmatmul.mubr.msk.bf16.vlgmr.msra.gmra.mxu1 %vm256_vm4, %v275_v7  ;;  %s822_s16 = scalar_lea.vmem %s580_s9, 256  ;;  %p827_p12 = scmp.lt.s32.totalorder %s580_s9, %s580_s9 }
 0x2d5   :  { %681 = vmatprep.mubr.msk.bf16.mxu1 %vm880_vm0, %v879_v0  ;;  %666 = vmatpush3.bf16.msra.mxu1 %v382_v11  ;;  %p823_p11 = scmp.ne.s32.totalorder %s580_s9, %s822_s16  ;;  %p828_p13 = scmp.lt.s32.totalorder %s822_s16, %s822_s16 }
 0x2d6   :  { %667 = vmatprep.subr.bf16.mxu1 %v879_v0 }
 0x2d7   :  { %p829_p0 = por %p828_p13, %p827_p12 }
 0x2d9   :  { %668 = vmatpush3.bf16.msra.mxu1 %v381_v13  ;;  %p830_p1 = pnand %p829_p0, %p823_p11 }
 0x2da   :  { %669 = vmatprep.subr.bf16.mxu1 %v879_v0 }
 0x2dd   :  { %670 = vmatpush3.bf16.msra.mxu1 %v380_v37 }
 0x2de   :  { %671 = vmatprep.subr.bf16.mxu1 %v879_v0 }
 0x2e1   :  { %672 = vmatpush3.bf16.msra.mxu1 %v379_v40 }
 0x2e2   :  { %673 = vmatprep.subr.bf16.mxu1 %v879_v0 }
 0x2e5   :  { %674 = vmatpush3.bf16.msra.mxu1 %v378_v45 }
 0x2e6   :  { %675 = vmatprep.subr.bf16.mxu1 %v879_v0 }
 0x2e9   :  { %676 = vmatpush3.bf16.msra.mxu1 %v377_v49 }
 0x2ea   :  { %677 = vmatprep.subr.bf16.mxu1 %v879_v0 }
 0x2ed   :  { %678 = vmatpush3.bf16.msra.mxu1 %v376_v53 }
 0x2ee   :  { %679 = vmatprep.subr.bf16.mxu1 %v879_v0 }
 0x2f1   :  { %680 = vmatpush3.bf16.msra.mxu1 %v375_v56 }
 0x358   :  { %v271_v14 = vpop.xlane.xlu1 %270 }
 0x359   :  { %706 = vrcp.f32 %v271_v14 }
 0x35c   :  { %v274_v15 = vpop.xlane.xlu1 %273 }
 0x35d   :  { %708 = vrcp.f32 %v274_v15 }
 0x366   :  { %v707_v16 = vpop.eup %706 }
 0x36a   :  { %v709_v22 = vpop.eup %708 }
 0x394   :  { %v314_v18 = vpop.f32.mrf.mxu1 }
 0x395   :  { %v325_v19 = vmul.f32 %v707_v16, %v314_v18 }
 0x396   :  { %v663_v20 = vpop.f32.mrf.mxu1 }
 0x397   :  { %v333_v21 = vadd.f32 %v612_v17, %v325_v19 }
 0x398   :  { %v317_v23 = vpop.f32.mrf.mxu1 }
 0x399   :  { %v335_v25 = vmax.f32 %v333_v21, 0.0  ;;  %v326_v26 = vmul.f32 %v709_v22, %v317_v23 }
 0x39a   :  { %v664_v27 = vpop.f32.mrf.mxu1 }
 0x39b   :  { %v334_v28 = vadd.f32 %v612_v17, %v326_v26  ;;  %v339_v29 = vmul.f32 %v337_v24, %v335_v25 }
 0x39d   :  { %v336_v31 = vmax.f32 %v334_v28, 0.0  ;;  %v341_v32 = vmul.f32 %v339_v29, %v339_v29 }
 0x39f   :  { %343 = vadd.xlane.f32.xlu1 %v341_v32  ;;  %v340_v33 = vmul.f32 %v338_v30, %v336_v31 }
 0x3a1   :  { %v342_v34 = vmul.f32 %v340_v33, %v340_v33 }
 0x3a3   :  { %345 = vadd.xlane.f32.xlu1 %v342_v34 }
 0x428   :  { %v344_v57 = vpop.xlane.xlu1 %343 }
 0x429   :  { %v347_v58 = vmax.f32 %v344_v57, 1e-24 }
 0x42b   :  { %710 = vrsqrt.f32 %v347_v58 }
 0x42c   :  { %v346_v59 = vpop.xlane.xlu1 %345 }
 0x42d   :  { %v348_v60 = vmax.f32 %v346_v59, 1e-24 }
 0x42f   :  { %712 = vrsqrt.f32 %v348_v60 }
 0x438   :  { %v711_v61 = vpop.eup %710 }
 0x439   :  { %v351_v62 = vmul.f32 %v711_v61, %v339_v29 }
 0x43b   :  { %353 = vst [vmem:[#allocation11] sm:$0xff] %v351_v62 }
 0x43c   :  { %v713_v63 = vpop.eup %712 }
 0x43d   :  { %v352_v1 = vmul.f32 %v713_v63, %v340_v33 }
 0x43f   :  { %v374_v2 = vpack.c.bf16 %v352_v1, %v351_v62  ;;  %354 = vst [vmem:[#allocation11 + $0x8] sm:$0xff] %v352_v1 }
 0x441   :  { %682 = vmatmul.mubr.bf16.vlgmr.msra.gmra.mxu1 %v374_v2 }
 0x501   :  { %v417_v0 = vpop.f32.mrf.mxu1 }
 0x502   :  { %v442_v4 = vmul.f32 %v614_v3, %v417_v0  ;;  %v430_v11 = vmul.f32 %v613_v10, %v417_v0 }
 0x503   :  { %v683_v5 = vpop.f32.mrf.mxu1 }
 0x504   :  { %444 = vadd.xlane.f32.xlu1 %v442_v4 }
 0x505   :  { %v420_v6 = vpop.f32.mrf.mxu1 }
 0x506   :  { %v513_v7 = vpack.c.bf16 %v420_v6, %v417_v0  ;;  %v443_v8 = vmul.f32 %v614_v3, %v420_v6  ;;  %v431_v12 = vmul.f32 %v613_v10, %v420_v6 }
 0x507   :  { %v684_v9 = vpop.f32.mrf.mxu1 }
 0x508   :  { %686 = vmatpush3.bf16.msra.mxu0 %v513_v7  ;;  %446 = vadd.xlane.f32.xlu1 %v443_v8 }
 0x50c   :  { %432 = vadd.xlane.f32.xlu1 %v430_v11 }
 0x510   :  { %434 = vadd.xlane.f32.xlu1 %v431_v12 }
 0x58d   :  { %v445_v13 = vpop.xlane.xlu1 %444 }
 0x58e   :  { %448 = vxpose.xlu1.b32.start [1/2] (short) (narrow) %v445_v13, 8 }
 0x591   :  { %v447_v14 = vpop.xlane.xlu1 %446 }
 0x592   :  { %449 = vxpose.xlu1.b32.end [2/2] (short) (narrow) %v447_v14, 8 }
 0x595   :  { %v433_v15 = vpop.xlane.xlu1 %432 }
 0x599   :  { %v435_v16 = vpop.xlane.xlu1 %434 }
 0x60a   :  { %v464_v17 = vpop.trf.xlu1 }
 0x60b   :  { %v483_v18 = vrot.slane %v464_v17, %v244_v44 }
 0x60d   :  { %v484_v19 = vadd.f32 %v483_v18, %v433_v15  ;;  %v485_v20 = vadd.f32 %v483_v18, %v435_v16 }
 0x60f   :  { %vm486_vm6 = vcmp.gt.f32.partialorder %v484_v19, 0.0  ;;  %v488_v21 = vmul.f32 0.2, %v484_v19  ;;  %vm487_vm7 = vcmp.gt.f32.partialorder %v485_v20, 0.0  ;;  %v489_v22 = vmul.f32 0.2, %v485_v20 }
 0x611   :  { %v490_v23 = vsel %vm486_vm6, %v484_v19, %v488_v21  ;;  %v491_v24 = vsel %vm487_vm7, %v485_v20, %v489_v22 }
 0x612   :  { %v492_v25 = vsel %vm113_vm1, %v490_v23, -1e+30  ;;  %v493_v27 = vsel %vm114_vm5, %v491_v24, -1e+30 }
 0x613   :  { %v494_v26 = vsel %vm256_vm4, %v492_v25, -inf  ;;  %v497_v42 = vsel %vm256_vm4, %v493_v27, -inf }
 0x614   :  { %495 = vmax.xlane.f32.xlu0 %v494_v26 }
 0x618   :  { %498 = vmax.xlane.f32.xlu0 %v497_v42 }
 0x69d   :  { %v496_v44 = vpop.xlane.xlu0 %495 }
 0x69e   :  { %v500_v28 = vsub.f32 %v492_v25, %v496_v44 }
 0x6a0   :  { %v502_v29 = vmul.f32 1.442695, %v500_v28 }
 0x6a1   :  { %v499_v30 = vpop.xlane.xlu0 %498 }
 0x6a2   :  { %714 = vpow2.f32 %v502_v29  ;;  %v501_v31 = vsub.f32 %v493_v27, %v499_v30 }
 0x6a4   :  { %v504_v32 = vmul.f32 1.442695, %v501_v31 }
 0x6a6   :  { %716 = vpow2.f32 %v504_v32 }
 0x6af   :  { %v715_v33 = vpop.eup %714 }
 0x6b0   :  { %v506_v47 = vsel %vm256_vm4, %v715_v33, 0.0 }
 0x6b1   :  { %507 = vadd.xlane.f32.xlu1 %v506_v47 }
 0x6b3   :  { %v717_v34 = vpop.eup %716 }
 0x6b4   :  { %v509_v35 = vsel %vm256_vm4, %v717_v34, 0.0  ;;  %v512_v51 = vpack.c.bf16 %v717_v34, %v715_v33 }
 0x6b5   :  { %510 = vadd.xlane.f32.xlu0 %v509_v35 }
 0x6b6   :  { %688 = vmatmul.mubr.msk.bf16.vlgmr.msra.gmra.mxu0 %vm256_vm4, %v512_v51 }
 0x6b7   :  { %833 = shalt.err (!%p830_p1)
}
 0x6b8   :  { %585 = dma.vmem_to_hbm [thread:$0]  %s580_s9, 256, %s1076_s11, [#allocation4], %s874_s26, %s874_s26, %s875_s27  }
 0x6b9   :  { %v616_v39 = vld [vmem:[%s1075_s10] ss:$0 sm:$0xff]  ;;  %s882_s20 = smov [#allocation12]  }
 0x6ba   :  { %s591_s3 = sshll.u32 %s882_s20, 4  ;;  %s592_s3 = int_to_ptr.vmem [resolvable:$true] %s591_s3 }
 0x6bb   :  { %s842_s11 = scalar_lea.vmem %s592_s3, 256  ;;  %p847_p3 = scmp.lt.s32.totalorder %s592_s3, %s592_s3 }
 0x6bc   :  { %p843_p2 = scmp.ne.s32.totalorder %s592_s3, %s842_s11  ;;  %p848_p4 = scmp.lt.s32.totalorder %s842_s11, %s842_s11 }
 0x6be   :  { %p849_p5 = por %p848_p4, %p847_p3 }
 0x6c0   :  { %p850_p6 = pnand %p849_p5, %p843_p2 }
 0x73a   :  { %v508_v36 = vpop.xlane.xlu1 %507 }
 0x73b   :  { %718 = vrcp.f32 %v508_v36 }
 0x73e   :  { %v511_v37 = vpop.xlane.xlu0 %510 }
 0x73f   :  { %720 = vrcp.f32 %v511_v37 }
 0x748   :  { %v719_v38 = vpop.eup %718 }
 0x74c   :  { %v721_v46 = vpop.eup %720 }
 0x776   :  { %v551_v40 = vpop.f32.mrf.mxu0 }
 0x777   :  { %v562_v41 = vmul.f32 %v719_v38, %v551_v40 }
 0x778   :  { %v689_v43 = vpop.f32.mrf.mxu0 }
 0x779   :  { %v570_v45 = vadd.f32 %v616_v39, %v562_v41 }
 0x77a   :  { %v554_v48 = vpop.f32.mrf.mxu0 }
 0x77b   :  { %572 = vst [vmem:[#allocation12] sm:$0xff] %v570_v45  ;;  %v563_v49 = vmul.f32 %v721_v46, %v554_v48 }
 0x77c   :  { %v690_v50 = vpop.f32.mrf.mxu0 }
 0x77d   :  { %v571_v52 = vadd.f32 %v616_v39, %v563_v49 }
 0x77f   :  { %573 = vst [vmem:[#allocation12 + $0x8] sm:$0xff] %v571_v52 }
 0x780   :  { %853 = shalt.err (!%p850_p6)
}
 0x781   :  { %597 = dma.vmem_to_hbm [thread:$0]  %s592_s3, 256, %s1077_s12, [#allocation13], %s874_s26, %s874_s26, %s875_s27  }
 0x782   :  { %868 = dma.done.wait [#allocation4], 256  }
 0x783   :  { %869 = vsyncadd [#allocation4], 4294967040 }
 0x784   :  { %870 = dma.done.wait [#allocation13], 256  }
 0x785   :  { %871 = vsyncadd [#allocation13], 4294967040 }
 0x786   :  { %604 = vsyncpa [#allocation3], 1 }
 0x787   :  { %605 = vsyncpa [#allocation6], 1 }
 0x788   :  { %606 = vsyncpa [#allocation9], 1 }
 0x789   :  { %607 = vsyncpa [#allocation4], 1 }
 0x78a   :  { %608 = vsyncpa [#allocation13], 1 }

</bundles_post_ra>
